<compile_context>
chip_gen: v7x
topology: tpu7x:2x2x1
jax: 0.10.0
libtpu: 0.0.40
codegen_flags: <defaults>
</compile_context>

<pallas_src>
import functools

import jax
import jax.numpy as jnp
from jax.experimental import pallas as pl
from jax.experimental.pallas import tpu as pltpu

IN_FEATURES = 115
D1, D2, D3, D4 = 128, 256, 64, 1


# ----------------------------- Pallas kernel --------------------------------


def mlp_kernel(x_ref,
               w1_ref, b1_ref,
               w2_ref, b2_ref,
               w3_ref, b3_ref,
               w4_ref, b4_ref,
               o_ref,
               *, bf16_epilogue):
    """Fused 4-layer MLP; activations kept transposed as (features, batch_tile)."""
    bf = jnp.bfloat16
    x = x_ref[...].astype(bf)                                  # (TB, 115) f32 -> bf16 in VMEM

    def bias_relu(acc_f32, b_ref):
        if bf16_epilogue:
            # bf16 VALU path (v6e/v7x): halves VPU slot pressure.
            return jnp.maximum(acc_f32.astype(bf) + b_ref[...].astype(bf), 0)
        # f32 VALU path (v5e and older: no bf16 VPU).
        return jnp.maximum(acc_f32 + b_ref[...], 0.0).astype(bf)

    # Layer 1: W1 @ x^T via NT dot, contracting only K=115 (pad lanes of the
    # VMEM tile are never touched) -> (128, TB) f32 accumulator.
    h = jax.lax.dot_general(w1_ref[...], x,
                            (((1,), (1,)), ((), ())),
                            preferred_element_type=jnp.float32)
    h = bias_relu(h, b1_ref)                                   # (128, TB) bf16

    # Layer 2: (256, 128) @ (128, TB) -> (256, TB)
    h = jnp.dot(w2_ref[...], h, preferred_element_type=jnp.float32)
    h = bias_relu(h, b2_ref)

    # Layer 3: (64, 256) @ (256, TB) -> (64, TB)
    h = jnp.dot(w3_ref[...], h, preferred_element_type=jnp.float32)
    h = bias_relu(h, b3_ref)

    # Layer 4 (head): (8, 64) @ (64, TB) -> (8, TB); row 0 holds the real logits.
    out8 = jnp.dot(w4_ref[...], h, preferred_element_type=jnp.float32)
    o_ref[...] = out8[0:1, :] + b4_ref[...]                    # (1, TB) lane-dense f32


# ------------------------------- wrapper -------------------------------------


def _cdiv(a, b):
    return (a + b - 1) // b


def _round_up(n, m):
    return _cdiv(n, m) * m


def _default_bf16_epilogue():
    """bf16 bias/ReLU only where the VPU has bf16 (v6e / v7x); f32 elsewhere."""
    try:
        kind = jax.devices()[0].device_kind.lower()
    except Exception:
        return False
    return not any(t in kind for t in ("v2", "v3", "v4", "v5"))


def prepare_params(params):
    """One-time weight/bias prep (hoisted out of the forward pass).

    Input params are in PyTorch layout: w_i (out_features, in_features), b_i (out,).
    """
    (w1, b1), (w2, b2), (w3, b3), (w4, b4) = params
    bf = jnp.bfloat16
    return {
        "w1": w1.astype(bf),                                          # (128, 115) -- UNpadded
        "w2": w2.astype(bf),                                          # (256, 128)
        "w3": w3.astype(bf),                                          # (64, 256)
        "w4": jnp.pad(w4, ((0, 8 - w4.shape[0]), (0, 0))).astype(bf), # (8, 64)
        "b1": b1.reshape(-1, 1).astype(jnp.float32),                  # (128, 1)
        "b2": b2.reshape(-1, 1).astype(jnp.float32),                  # (256, 1)
        "b3": b3.reshape(-1, 1).astype(jnp.float32),                  # (64, 1)
        "b4": b4.reshape(-1, 1).astype(jnp.float32),                  # (1, 1)
    }


def aftershock_classifier_forward(x, prepared, *, batch_tile=1024, bf16_epilogue=None):
    """x: (B, 115) float32. Returns (B, 1) float32 logits (eval-mode forward)."""
    B, F = x.shape
    assert F == IN_FEATURES
    assert batch_tile % 256 == 0, "batch_tile should be a multiple of 256 (MXU-aligned)"
    if bf16_epilogue is None:
        bf16_epilogue = _default_bf16_epilogue()

    # Batch tile: MXU-aligned, large by default (amortizes the ~0.35us/step
    # overhead on v5e/v6e), and capped at ~B/2 so the "parallel" grid has >= 2
    # steps for B >= 512 (both v7x TensorCores get work).
    bt = min(batch_tile, max(256, _round_up(_cdiv(B, 2), 256)))
    B_pad = _round_up(B, bt)
    num_tiles = B_pad // bt

    # Only the batch dim is ever padded, f32, and only when B % bt != 0.
    # No feature padding and no wrapper-side bf16 cast of x.
    x_in = x if B_pad == B else jnp.pad(x, ((0, B_pad - B), (0, 0)))

    p = prepared
    row = lambda i: (i, 0)        # batch-tiled input (batch on sublanes in HBM)
    col = lambda i: (0, i)        # batch-tiled, lane-dense output
    full = lambda i: (0, 0)       # grid-invariant weights / biases (fetched once)

    kernel = functools.partial(mlp_kernel, bf16_epilogue=bf16_epilogue)

    out = pl.pallas_call(
        kernel,
        out_shape=jax.ShapeDtypeStruct((1, B_pad), jnp.float32),
        grid_spec=pltpu.PrefetchScalarGridSpec(
            num_scalar_prefetch=0,
            grid=(num_tiles,),
            in_specs=[
                pl.BlockSpec((bt, IN_FEATURES), row),     # x (f32, unpadded features)
                pl.BlockSpec((D1, IN_FEATURES), full),    # w1 (128, 115)
                pl.BlockSpec((D1, 1), full),              # b1
                pl.BlockSpec((D2, D1), full),             # w2
                pl.BlockSpec((D2, 1), full),              # b2
                pl.BlockSpec((D3, D2), full),             # w3
                pl.BlockSpec((D3, 1), full),              # b3
                pl.BlockSpec((8, D3), full),              # w4 (zero-padded to 8 rows)
                pl.BlockSpec((1, 1), full),               # b4
            ],
            out_specs=pl.BlockSpec((1, bt), col),
        ),
        compiler_params=pltpu.CompilerParams(
            dimension_semantics=("parallel",),
            # Safe on every generation (v7x physical VMEM is 64 MiB); gives
            # headroom for batch tiles well beyond the 1024 default.
            vmem_limit_bytes=48 * 1024 * 1024,
        ),
    )(x_in, p["w1"], p["b1"], p["w2"], p["b2"], p["w3"], p["b3"], p["w4"], p["b4"])

    return out[0, :B].reshape(B, 1)


# ------------------------- deterministic param init --------------------------


def init_linear(key, fan_in, fan_out):
    """PyTorch nn.Linear default init, PyTorch layout: w (out, in), b (out,)."""
    kw, kb = jax.random.split(key)
    bound = 1.0 / jnp.sqrt(jnp.float32(fan_in))
    w = jax.random.uniform(kw, (fan_out, fan_in), jnp.float32, -bound, bound)
    b = jax.random.uniform(kb, (fan_out,), jnp.float32, -bound, bound)
    return w, b


def init_params(key):
    k1, k2, k3, k4 = jax.random.split(key, 4)
    return (
        init_linear(k1, 115, 128),
        init_linear(k2, 128, 256),
        init_linear(k3, 256, 64),
        init_linear(k4, 64, 1),
    )


def reference_forward(x, params, *, bf16_epilogue=False):
    """Pure-JAX reference with the same numerics recipe as the kernel."""
    (w1, b1), (w2, b2), (w3, b3), (w4, b4) = params
    bf = jnp.bfloat16
    h = x
    for w, b in ((w1, b1), (w2, b2), (w3, b3)):
        acc = jnp.dot(h.astype(bf), w.T.astype(bf), preferred_element_type=jnp.float32)
        if bf16_epilogue:
            h = jnp.maximum(acc.astype(bf) + b.astype(bf), 0)
        else:
            h = jnp.maximum(acc + b, 0.0)
    return jnp.dot(h.astype(bf), w4.T.astype(bf),
                   preferred_element_type=jnp.float32) + b4


# ---------------------------------- main --------------------------------------

if __name__ == "__main__":
    key = jax.random.PRNGKey(0)
    kx, kp = jax.random.split(key)

    B = 16  # small demo batch; wrapper pads the batch dim to one MXU-aligned tile
    x = jax.random.normal(kx, (B, 115), jnp.float32)
    params = init_params(kp)
    prepared = prepare_params(params)          # one-time weight/bias prep

    use_bf16_epilogue = _default_bf16_epilogue()

    out = aftershock_classifier_forward(x, prepared, bf16_epilogue=use_bf16_epilogue)
    out = jax.block_until_ready(out)

    ref = reference_forward(x, params, bf16_epilogue=use_bf16_epilogue)
    assert out.shape == (B, 1)
    max_err = jnp.max(jnp.abs(out - ref))
    assert jnp.allclose(out, ref, atol=5e-3, rtol=5e-3), \
        f"mismatch vs reference (max abs err {max_err})"

    print("KERNEL_OK")
</pallas_src>

<mosaic_0001>
module attributes {stable_mosaic.version = 11 : i64} {
  func.func @mlp_kernel(%arg0: i32, %arg1: memref<256x115xf32, #tpu.memory_space<vmem>>, %arg2: memref<128x115xbf16, #tpu.memory_space<vmem>>, %arg3: memref<128x1xf32, #tpu.memory_space<vmem>>, %arg4: memref<256x128xbf16, #tpu.memory_space<vmem>>, %arg5: memref<256x1xf32, #tpu.memory_space<vmem>>, %arg6: memref<64x256xbf16, #tpu.memory_space<vmem>>, %arg7: memref<64x1xf32, #tpu.memory_space<vmem>>, %arg8: memref<8x64xbf16, #tpu.memory_space<vmem>>, %arg9: memref<1x1xf32, #tpu.memory_space<vmem>>, %arg10: memref<1x256xf32, #tpu.memory_space<vmem>>) attributes {dimension_semantics = [#tpu.dimension_semantics<parallel>], iteration_bounds = array<i64: 1>, scalar_prefetch = 0 : i64, scratch_operands = 0 : i64, tpu.core_type = #tpu.core_type<tc>, window_params = [{transform_indices = @transform_0, window_bounds = array<i64: 256, 115>}, {pipeline_mode = #tpu.pipeline_mode<synchronous>, transform_indices = @transform_1, window_bounds = array<i64: 128, 115>}, {pipeline_mode = #tpu.pipeline_mode<synchronous>, transform_indices = @transform_2, window_bounds = array<i64: 128, 1>}, {pipeline_mode = #tpu.pipeline_mode<synchronous>, transform_indices = @transform_3, window_bounds = array<i64: 256, 128>}, {pipeline_mode = #tpu.pipeline_mode<synchronous>, transform_indices = @transform_4, window_bounds = array<i64: 256, 1>}, {pipeline_mode = #tpu.pipeline_mode<synchronous>, transform_indices = @transform_5, window_bounds = array<i64: 64, 256>}, {pipeline_mode = #tpu.pipeline_mode<synchronous>, transform_indices = @transform_6, window_bounds = array<i64: 64, 1>}, {pipeline_mode = #tpu.pipeline_mode<synchronous>, transform_indices = @transform_7, window_bounds = array<i64: 8, 64>}, {pipeline_mode = #tpu.pipeline_mode<synchronous>, transform_indices = @transform_8, window_bounds = array<i64: 1, 1>}, {transform_indices = @transform_9, window_bounds = array<i64: 1, 256>}]} {
    %c0 = arith.constant 0 : index
    %c0_0 = arith.constant 0 : index
    %0 = vector.load %arg1[%c0, %c0_0] : memref<256x115xf32, #tpu.memory_space<vmem>>, vector<256x115xf32>
    %1 = arith.truncf %0 : vector<256x115xf32> to vector<256x115xbf16>
    %c0_1 = arith.constant 0 : index
    %c0_2 = arith.constant 0 : index
    %2 = vector.load %arg2[%c0_1, %c0_2] : memref<128x115xbf16, #tpu.memory_space<vmem>>, vector<128x115xbf16>
    %cst = arith.constant dense<0.000000e+00> : vector<128x256xf32>
    %3 = tpu.matmul %2, %1, %cst {dimension_numbers = #tpu.dot_dimension_numbers<[1], [1], [0], [0], [0, 0, 1, 0], [], []>} : vector<128x115xbf16>, vector<256x115xbf16>, vector<128x256xf32> -> vector<128x256xf32>
    %4 = arith.truncf %3 : vector<128x256xf32> to vector<128x256xbf16>
    %c0_3 = arith.constant 0 : index
    %c0_4 = arith.constant 0 : index
    %5 = vector.load %arg3[%c0_3, %c0_4] : memref<128x1xf32, #tpu.memory_space<vmem>>, vector<128x1xf32>
    %6 = arith.truncf %5 : vector<128x1xf32> to vector<128x1xbf16>
    %7 = vector.broadcast %6 : vector<128x1xbf16> to vector<128x256xbf16>
    %8 = arith.addf %4, %7 : vector<128x256xbf16>
    %cst_5 = arith.constant 0.000000e+00 : bf16
    %9 = vector.broadcast %cst_5 : bf16 to vector<128x256xbf16>
    %10 = arith.maximumf %8, %9 : vector<128x256xbf16>
    %c0_6 = arith.constant 0 : index
    %c0_7 = arith.constant 0 : index
    %11 = vector.load %arg4[%c0_6, %c0_7] : memref<256x128xbf16, #tpu.memory_space<vmem>>, vector<256x128xbf16>
    %cst_8 = arith.constant dense<0.000000e+00> : vector<256x256xf32>
    %12 = tpu.matmul %11, %10, %cst_8 {dimension_numbers = #tpu.dot_dimension_numbers<[1], [0], [0], [1], [0, 0, 1, 1], [], []>} : vector<256x128xbf16>, vector<128x256xbf16>, vector<256x256xf32> -> vector<256x256xf32>
    %13 = arith.truncf %12 : vector<256x256xf32> to vector<256x256xbf16>
    %c0_9 = arith.constant 0 : index
    %c0_10 = arith.constant 0 : index
    %14 = vector.load %arg5[%c0_9, %c0_10] : memref<256x1xf32, #tpu.memory_space<vmem>>, vector<256x1xf32>
    %15 = arith.truncf %14 : vector<256x1xf32> to vector<256x1xbf16>
    %16 = vector.broadcast %15 : vector<256x1xbf16> to vector<256x256xbf16>
    %17 = arith.addf %13, %16 : vector<256x256xbf16>
    %cst_11 = arith.constant 0.000000e+00 : bf16
    %18 = vector.broadcast %cst_11 : bf16 to vector<256x256xbf16>
    %19 = arith.maximumf %17, %18 : vector<256x256xbf16>
    %c0_12 = arith.constant 0 : index
    %c0_13 = arith.constant 0 : index
    %20 = vector.load %arg6[%c0_12, %c0_13] : memref<64x256xbf16, #tpu.memory_space<vmem>>, vector<64x256xbf16>
    %cst_14 = arith.constant dense<0.000000e+00> : vector<64x256xf32>
    %21 = tpu.matmul %20, %19, %cst_14 {dimension_numbers = #tpu.dot_dimension_numbers<[1], [0], [0], [1], [0, 0, 1, 1], [], []>} : vector<64x256xbf16>, vector<256x256xbf16>, vector<64x256xf32> -> vector<64x256xf32>
    %22 = arith.truncf %21 : vector<64x256xf32> to vector<64x256xbf16>
    %c0_15 = arith.constant 0 : index
    %c0_16 = arith.constant 0 : index
    %23 = vector.load %arg7[%c0_15, %c0_16] : memref<64x1xf32, #tpu.memory_space<vmem>>, vector<64x1xf32>
    %24 = arith.truncf %23 : vector<64x1xf32> to vector<64x1xbf16>
    %25 = vector.broadcast %24 : vector<64x1xbf16> to vector<64x256xbf16>
    %26 = arith.addf %22, %25 : vector<64x256xbf16>
    %cst_17 = arith.constant 0.000000e+00 : bf16
    %27 = vector.broadcast %cst_17 : bf16 to vector<64x256xbf16>
    %28 = arith.maximumf %26, %27 : vector<64x256xbf16>
    %c0_18 = arith.constant 0 : index
    %c0_19 = arith.constant 0 : index
    %29 = vector.load %arg8[%c0_18, %c0_19] : memref<8x64xbf16, #tpu.memory_space<vmem>>, vector<8x64xbf16>
    %cst_20 = arith.constant dense<0.000000e+00> : vector<8x256xf32>
    %30 = tpu.matmul %29, %28, %cst_20 {dimension_numbers = #tpu.dot_dimension_numbers<[1], [0], [0], [1], [0, 0, 1, 1], [], []>} : vector<8x64xbf16>, vector<64x256xbf16>, vector<8x256xf32> -> vector<8x256xf32>
    %31 = vector.extract_strided_slice %30 {offsets = [0, 0], sizes = [1, 256], strides = [1, 1]} : vector<8x256xf32> to vector<1x256xf32>
    %c0_21 = arith.constant 0 : index
    %c0_22 = arith.constant 0 : index
    %32 = vector.load %arg9[%c0_21, %c0_22] : memref<1x1xf32, #tpu.memory_space<vmem>>, vector<1x1xf32>
    %33 = vector.broadcast %32 : vector<1x1xf32> to vector<1x256xf32>
    %34 = arith.addf %31, %33 : vector<1x256xf32>
    %c0_23 = arith.constant 0 : index
    %c0_24 = arith.constant 0 : index
    %35 = vector.load %arg10[%c0_23, %c0_24] : memref<1x256xf32, #tpu.memory_space<vmem>>, vector<1x256xf32>
    tpu.vector_store %arg10[%c0_23, %c0_24], %34 {strides = array<i32>} : memref<1x256xf32, #tpu.memory_space<vmem>>, vector<1x256xf32>,
    return
  }
  func.func @transform_0(%arg0: i32) -> (i32, i32) {
    %c0_i32 = arith.constant 0 : i32
    %c0_i32_0 = arith.constant 0 : i32
    return %arg0, %c0_i32 : i32, i32
  }
  func.func @transform_1(%arg0: i32) -> (i32, i32) {
    %c0_i32 = arith.constant 0 : i32
    %c0_i32_0 = arith.constant 0 : i32
    %c0_i32_1 = arith.constant 0 : i32
    return %c0_i32, %c0_i32_0 : i32, i32
  }
  func.func @transform_2(%arg0: i32) -> (i32, i32) {
    %c0_i32 = arith.constant 0 : i32
    %c0_i32_0 = arith.constant 0 : i32
    %c0_i32_1 = arith.constant 0 : i32
    return %c0_i32, %c0_i32_0 : i32, i32
  }
  func.func @transform_3(%arg0: i32) -> (i32, i32) {
    %c0_i32 = arith.constant 0 : i32
    %c0_i32_0 = arith.constant 0 : i32
    %c0_i32_1 = arith.constant 0 : i32
    return %c0_i32, %c0_i32_0 : i32, i32
  }
  func.func @transform_4(%arg0: i32) -> (i32, i32) {
    %c0_i32 = arith.constant 0 : i32
    %c0_i32_0 = arith.constant 0 : i32
    %c0_i32_1 = arith.constant 0 : i32
    return %c0_i32, %c0_i32_0 : i32, i32
  }
  func.func @transform_5(%arg0: i32) -> (i32, i32) {
    %c0_i32 = arith.constant 0 : i32
    %c0_i32_0 = arith.constant 0 : i32
    %c0_i32_1 = arith.constant 0 : i32
    return %c0_i32, %c0_i32_0 : i32, i32
  }
  func.func @transform_6(%arg0: i32) -> (i32, i32) {
    %c0_i32 = arith.constant 0 : i32
    %c0_i32_0 = arith.constant 0 : i32
    %c0_i32_1 = arith.constant 0 : i32
    return %c0_i32, %c0_i32_0 : i32, i32
  }
  func.func @transform_7(%arg0: i32) -> (i32, i32) {
    %c0_i32 = arith.constant 0 : i32
    %c0_i32_0 = arith.constant 0 : i32
    %c0_i32_1 = arith.constant 0 : i32
    return %c0_i32, %c0_i32_0 : i32, i32
  }
  func.func @transform_8(%arg0: i32) -> (i32, i32) {
    %c0_i32 = arith.constant 0 : i32
    %c0_i32_0 = arith.constant 0 : i32
    %c0_i32_1 = arith.constant 0 : i32
    return %c0_i32, %c0_i32_0 : i32, i32
  }
  func.func @transform_9(%arg0: i32) -> (i32, i32) {
    %c0_i32 = arith.constant 0 : i32
    %c0_i32_0 = arith.constant 0 : i32
    return %c0_i32, %arg0 : i32, i32
  }
}

</mosaic_0001>

<bundles_post_ra>
// kernel: tpu_custom_call.1
= control target key start
LH: loop header
LB: loop body
LE: loop exit
PB: predicated region body
PF: predicated region fallthrough
CT: control target
= control target key end

     0   :  { %s1943_s0 = inlined_call_operand.vmem [shape: f32[256,115], index: 0, kind: input, shape index: {}]   ;;  %s1944_s1 = inlined_call_operand.vmem [shape: bf16[128,115], index: 1, kind: input, shape index: {}]   ;;  %s1945_s2 = inlined_call_operand.vmem [shape: f32[128,1], index: 2, kind: input, shape index: {}]   ;;  %s1946_s3 = inlined_call_operand.vmem [shape: bf16[256,128], index: 3, kind: input, shape index: {}]   ;;  %s1947_s4 = inlined_call_operand.vmem [shape: f32[256,1], index: 4, kind: input, shape index: {}]   ;;  %s1948_s5 = inlined_call_operand.vmem [shape: bf16[64,256], index: 5, kind: input, shape index: {}]   ;;  %s1949_s6 = inlined_call_operand.vmem [shape: f32[64,1], index: 6, kind: input, shape index: {}]   ;;  %s1950_s7 = inlined_call_operand.vmem [shape: bf16[8,64], index: 7, kind: input, shape index: {}]   ;;  %s1951_s8 = inlined_call_operand.<no memory space> [shape: f32[1,1], index: 8, kind: input, shape index: {}]   ;;  %s1952_s9 = inlined_call_operand.hbm [shape: f32[1,256], index: 9, kind: output, shape index: {}]  }
   0x1   :  { %v14_v0 = vstv %s1951_s8 }
   0x2   :  { %15 = vst [vmem:[#allocation2] sm:$0x1] %v14_v0 }
   0x3   :  { %v52_v1 = vld [vmem:[%s1943_s0 + $0x80] sm:$0xff]  ;;  %v53_v2 = vld [vmem:[%s1943_s0 + $0x88] sm:$0xff]  ;;  %vm140_vm0 = vcmask 941056   ;;  %v54_v6 = vld [vmem:[%s1943_s0 + $0x90] sm:$0xff]  ;;  %v1401_v8 = vmov 0  }
   0x4   :  { %v36_v3 = vld [vmem:[%s1943_s0] sm:$0xff]  ;;  %v76_v4 = vpack.c.bf16 %v53_v2, %v52_v1  ;;  %v37_v5 = vld [vmem:[%s1943_s0 + $0x8] sm:$0xff]  ;;  %v55_v7 = vld [vmem:[%s1943_s0 + $0x98] sm:$0xff]  ;;  %1339 = vset.pattern.permute.xlu0 %v1401_v8  ;;  %1340 = vset.pattern.permute.xlu1 %v1401_v8 }
   0x5   :  { %v68_v9 = vpack.c.bf16 %v37_v5, %v36_v3  ;;  %v77_v10 = vpack.c.bf16 %v55_v7, %v54_v6  ;;  %598 = vmatprep.mubr.bf16.mxu1 %v1401_v8  ;;  %v38_v11 = vld [vmem:[%s1943_s0 + $0x10] sm:$0xff]  ;;  %v39_v12 = vld [vmem:[%s1943_s0 + $0x18] sm:$0xff]  ;;  %v56_v15 = vld [vmem:[%s1943_s0 + $0xa0] sm:$0xff] }
   0x6   :  { %1328 = vmatprep.subr.msk.bf16.mxu0 %vm140_vm0, %v76_v4  ;;  %v69_v14 = vpack.c.bf16 %v39_v12, %v38_v11  ;;  %v57_v16 = vld [vmem:[%s1943_s0 + $0xa8] sm:$0xff]  ;;  %v40_v19 = vld [vmem:[%s1943_s0 + $0x20] sm:$0xff]  ;;  %v58_v23 = vld [vmem:[%s1943_s0 + $0xb0] sm:$0xff] }
   0x7   :  { %v166_v13 = vsel %vm140_vm0, %v68_v9, 0  ;;  %v78_v18 = vpack.c.bf16 %v57_v16, %v56_v15  ;;  %v41_v20 = vld [vmem:[%s1943_s0 + $0x28] sm:$0xff]  ;;  %v1503_v21 = vld [vmem:[%s1944_s1] sm:$0xff]   ;;  %v59_v24 = vld [vmem:[%s1943_s0 + $0xb8] sm:$0xff] }
   0x8   :  { %1297 = vmatpush3.bf16.xpose.msra.mxu0 %v166_v13  ;;  %v169_v17 = vsel %vm140_vm0, %v69_v14, 0  ;;  %1312 = vmatprep.mubr.msk.bf16.mxu0 %vm140_vm0, %v1503_v21  ;;  %v70_v22 = vpack.c.bf16 %v41_v20, %v40_v19  ;;  %v42_v25 = vld [vmem:[%s1943_s0 + $0x30] sm:$0xff]  ;;  %v79_v27 = vpack.c.bf16 %v59_v24, %v58_v23  ;;  %v43_v28 = vld [vmem:[%s1943_s0 + $0x38] sm:$0xff]  ;;  %v342_v29 = vld [vmem:[%s1945_s2] sm:$0xff] }
   0x9   :  { %1329 = vmatprep.subr.msk.bf16.mxu0 %vm140_vm0, %v77_v10  ;;  %v343_v30 = vld [vmem:[%s1945_s2 + $0x8] sm:$0xff]  ;;  %v344_v31 = vld [vmem:[%s1945_s2 + $0x10] sm:$0xff]  ;;  %v345_v32 = vld [vmem:[%s1945_s2 + $0x18] sm:$0xff]  ;;  %v71_v36 = vpack.c.bf16 %v43_v28, %v42_v25 }
   0xa   :  { %v172_v26 = vsel %vm140_vm0, %v70_v22, 0  ;;  %v358_v33 = vpack.c.bf16 %v343_v30, %v342_v29  ;;  %v346_v34 = vld [vmem:[%s1945_s2 + $0x20] sm:$0xff]  ;;  %v347_v35 = vld [vmem:[%s1945_s2 + $0x28] sm:$0xff]  ;;  %v359_v38 = vpack.c.bf16 %v345_v32, %v344_v31  ;;  %v348_v40 = vld [vmem:[%s1945_s2 + $0x30] sm:$0xff] }
   0xb   :  { %v60_v37 = vld [vmem:[%s1943_s0 + $0xc0] sm:$0xff]  ;;  %v360_v39 = vpack.c.bf16 %v347_v35, %v346_v34  ;;  %v349_v41 = vld [vmem:[%s1945_s2 + $0x38] sm:$0xff]  ;;  %v61_v42 = vld [vmem:[%s1943_s0 + $0xc8] sm:$0xff]  ;;  %v175_v48 = vsel %vm140_vm0, %v71_v36, 0 }
   0xc   :  { %368 = vperm.xlu0 %1339, %v358_v33   ;;  %v350_v43 = vld [vmem:[%s1945_s2 + $0x40] sm:$0xff]  ;;  %v351_v44 = vld [vmem:[%s1945_s2 + $0x48] sm:$0xff]  ;;  %v361_v45 = vpack.c.bf16 %v349_v41, %v348_v40  ;;  %v352_v46 = vld [vmem:[%s1945_s2 + $0x50] sm:$0xff]  ;;  %v80_v49 = vpack.c.bf16 %v61_v42, %v60_v37 }
   0xd   :  { %378 = vperm.xlu1 %1340, %v360_v39   ;;  %v353_v47 = vld [vmem:[%s1945_s2 + $0x58] sm:$0xff]  ;;  %v44_v50 = vld [vmem:[%s1943_s0 + $0x40] sm:$0xff]  ;;  %v362_v51 = vpack.c.bf16 %v351_v44, %v350_v43  ;;  %v45_v52 = vld [vmem:[%s1943_s0 + $0x48] sm:$0xff] }
   0xe   :  { %v354_v53 = vld [vmem:[%s1945_s2 + $0x60] sm:$0xff]  ;;  %v355_v54 = vld [vmem:[%s1945_s2 + $0x68] sm:$0xff]  ;;  %v363_v55 = vpack.c.bf16 %v353_v47, %v352_v46  ;;  %v356_v56 = vld [vmem:[%s1945_s2 + $0x70] sm:$0xff]  ;;  %v72_v58 = vpack.c.bf16 %v45_v52, %v44_v50 }
   0xf   :  { %v357_v57 = vld [vmem:[%s1945_s2 + $0x78] sm:$0xff]  ;;  %v62_v59 = vld [vmem:[%s1943_s0 + $0xd0] sm:$0xff]  ;;  %v364_v62 = vpack.c.bf16 %v355_v54, %v354_v53  ;;  %v791_v0 = vld [vmem:[%s1947_s4] sm:$0xff] }
  0x10   :  { %1299 = vmatpush3.bf16.xpose.msra.mxu0 %v169_v17  ;;  %373 = vperm.xlu0 %1339, %v359_v38   ;;  %v46_v60 = vld [vmem:[%s1943_s0 + $0x50] sm:$0xff]  ;;  %v47_v61 = vld [vmem:[%s1943_s0 + $0x58] sm:$0xff]  ;;  %v792_v1 = vld [vmem:[%s1947_s4 + $0x8] sm:$0xff]  ;;  %v365_v2 = vpack.c.bf16 %v357_v57, %v356_v56  ;;  %v178_v6 = vsel %vm140_vm0, %v72_v58, 0 }
  0x11   :  { %1330 = vmatprep.subr.msk.bf16.mxu0 %vm140_vm0, %v78_v18  ;;  %383 = vperm.xlu1 %1340, %v361_v45   ;;  %v63_v63 = vld [vmem:[%s1943_s0 + $0xd8] sm:$0xff]  ;;  %v73_v3 = vpack.c.bf16 %v47_v61, %v46_v60  ;;  %v793_v4 = vld [vmem:[%s1947_s4 + $0x10] sm:$0xff]  ;;  %v823_v9 = vpack.c.bf16 %v792_v1, %v791_v0  ;;  %v795_v10 = vld [vmem:[%s1947_s4 + $0x20] sm:$0xff] }
  0x12   :  { %v794_v5 = vld [vmem:[%s1947_s4 + $0x18] sm:$0xff]  ;;  %v81_v7 = vpack.c.bf16 %v63_v63, %v62_v59  ;;  %v796_v11 = vld [vmem:[%s1947_s4 + $0x28] sm:$0xff]  ;;  %v64_v14 = vld [vmem:[%s1943_s0 + $0xe0] sm:$0xff] }
  0x13   :  { %v824_v12 = vpack.c.bf16 %v794_v5, %v793_v4  ;;  %v181_v13 = vsel %vm140_vm0, %v73_v3, 0  ;;  %v65_v15 = vld [vmem:[%s1943_s0 + $0xe8] sm:$0xff]  ;;  %v799_v16 = vld [vmem:[%s1947_s4 + $0x40] sm:$0xff]  ;;  %v797_v18 = vld [vmem:[%s1947_s4 + $0x30] sm:$0xff]  ;;  %v825_v20 = vpack.c.bf16 %v796_v11, %v795_v10 }
  0x14   :  { %388 = vperm.xlu0 %1339, %v362_v51   ;;  %v800_v17 = vld [vmem:[%s1947_s4 + $0x48] sm:$0xff]  ;;  %v798_v19 = vld [vmem:[%s1947_s4 + $0x38] sm:$0xff]  ;;  %v801_v22 = vld [vmem:[%s1947_s4 + $0x50] sm:$0xff]  ;;  %v82_v29 = vpack.c.bf16 %v65_v15, %v64_v14 }
  0x15   :  { %393 = vperm.xlu1 %1340, %v363_v55   ;;  %v802_v23 = vld [vmem:[%s1947_s4 + $0x58] sm:$0xff]  ;;  %v826_v24 = vpack.c.bf16 %v798_v19, %v797_v18  ;;  %v48_v25 = vld [vmem:[%s1943_s0 + $0x60] sm:$0xff]  ;;  %v804_v28 = vld [vmem:[%s1947_s4 + $0x68] sm:$0xff]  ;;  %v827_v30 = vpack.c.bf16 %v800_v17, %v799_v16 }
  0x16   :  { %v805_v31 = vld [vmem:[%s1947_s4 + $0x70] sm:$0xff]  ;;  %v806_v32 = vld [vmem:[%s1947_s4 + $0x78] sm:$0xff]  ;;  %v828_v33 = vpack.c.bf16 %v802_v23, %v801_v22  ;;  %v807_v36 = vld [vmem:[%s1947_s4 + $0x80] sm:$0xff] }
  0x17   :  { %v66_v34 = vld [vmem:[%s1943_s0 + $0xf0] sm:$0xff]  ;;  %v67_v35 = vld [vmem:[%s1943_s0 + $0xf8] sm:$0xff]  ;;  %v808_v37 = vld [vmem:[%s1947_s4 + $0x88] sm:$0xff]  ;;  %v830_v42 = vpack.c.bf16 %v806_v32, %v805_v31 }
  0x18   :  { %1301 = vmatpush3.bf16.xpose.msra.mxu0 %v172_v26  ;;  %398 = vperm.xlu0 %1339, %v364_v62   ;;  %v49_v26 = vld [vmem:[%s1943_s0 + $0x68] sm:$0xff]  ;;  %v809_v40 = vld [vmem:[%s1947_s4 + $0x90] sm:$0xff]  ;;  %v810_v41 = vld [vmem:[%s1947_s4 + $0x98] sm:$0xff]  ;;  %v83_v46 = vpack.c.bf16 %v67_v35, %v66_v34  ;;  %v831_v47 = vpack.c.bf16 %v808_v37, %v807_v36 }
  0x19   :  { %1331 = vmatprep.subr.msk.bf16.mxu0 %vm140_vm0, %v79_v27  ;;  %403 = vperm.xlu1 %1340, %v365_v2   ;;  %v803_v27 = vld [vmem:[%s1947_s4 + $0x60] sm:$0xff]  ;;  %v74_v38 = vpack.c.bf16 %v49_v26, %v48_v25  ;;  %v50_v43 = vld [vmem:[%s1943_s0 + $0x70] sm:$0xff]  ;;  %v51_v44 = vld [vmem:[%s1943_s0 + $0x78] sm:$0xff] }
  0x1a   :  { %v829_v39 = vpack.c.bf16 %v804_v28, %v803_v27 }
  0x1b   :  { %v184_v45 = vsel %vm140_vm0, %v74_v38, 0 }
  0x1c   :  { %841 = vperm.xlu0 %1339, %v823_v9  }
  0x1d   :  { %846 = vperm.xlu1 %1340, %v824_v12  }
  0x20   :  { %1303 = vmatpush3.bf16.xpose.msra.mxu0 %v175_v48  ;;  %851 = vperm.xlu0 %1339, %v825_v20   ;;  %v811_v48 = vld [vmem:[%s1947_s4 + $0xa0] sm:$0xff] }
  0x21   :  { %1332 = vmatprep.subr.msk.bf16.mxu0 %vm140_vm0, %v80_v49  ;;  %856 = vperm.xlu1 %1340, %v826_v24   ;;  %v812_v49 = vld [vmem:[%s1947_s4 + $0xa8] sm:$0xff] }
  0x24   :  { %861 = vperm.xlu0 %1339, %v827_v30  }
  0x25   :  { %866 = vperm.xlu1 %1340, %v828_v33  }
  0x28   :  { %1305 = vmatpush3.bf16.xpose.msra.mxu0 %v178_v6  ;;  %871 = vperm.xlu0 %1339, %v829_v39  }
  0x29   :  { %1333 = vmatprep.subr.msk.bf16.mxu0 %vm140_vm0, %v81_v7 }
  0x30   :  { %1307 = vmatpush3.bf16.xpose.msra.mxu0 %v181_v13 }
  0x31   :  { %1334 = vmatprep.subr.msk.bf16.mxu0 %vm140_vm0, %v82_v29 }
  0x32   :  { %16 = vsyncpa [#allocation4], 0  ;;  %876 = vperm.xlu1 %1340, %v830_v42   ;;  %v832_v50 = vpack.c.bf16 %v810_v41, %v809_v40  ;;  %v813_v51 = vld [vmem:[%s1947_s4 + $0xb0] sm:$0xff]  ;;  %v814_v52 = vld [vmem:[%s1947_s4 + $0xb8] sm:$0xff]  ;;  %v75_v53 = vpack.c.bf16 %v51_v44, %v50_v43  ;;  %881 = vperm.xlu0 %1339, %v831_v47   ;;  %v833_v54 = vpack.c.bf16 %v812_v49, %v811_v48  ;;  %vm1161_vm1 = vcmask 523264   ;;  %s1403_s12 = smov [#allocation3]  }
  0x33   :  { %v815_v55 = vld [vmem:[%s1947_s4 + $0xc0] sm:$0xff]  ;;  %v816_v56 = vld [vmem:[%s1947_s4 + $0xc8] sm:$0xff]  ;;  %v834_v57 = vpack.c.bf16 %v814_v52, %v813_v51  ;;  %v817_v58 = vld [vmem:[%s1947_s4 + $0xd0] sm:$0xff] }
  0x34   :  { %v818_v59 = vld [vmem:[%s1947_s4 + $0xd8] sm:$0xff]  ;;  %v187_v60 = vsel %vm140_vm0, %v75_v53, 0  ;;  %v835_v61 = vpack.c.bf16 %v816_v56, %v815_v55  ;;  %v819_v62 = vld [vmem:[%s1947_s4 + $0xe0] sm:$0xff]  ;;  %v820_v63 = vld [vmem:[%s1947_s4 + $0xe8] sm:$0xff] }
  0x35   :  { %v836_v0 = vpack.c.bf16 %v818_v59, %v817_v58  ;;  %v821_v1 = vld [vmem:[%s1947_s4 + $0xf0] sm:$0xff]  ;;  %v822_v2 = vld [vmem:[%s1947_s4 + $0xf8] sm:$0xff]  ;;  %v837_v3 = vpack.c.bf16 %v820_v63, %v819_v62  ;;  %v1112_v4 = vld [vmem:[%s1949_s6] sm:$0xff] }
  0x36   :  { %886 = vperm.xlu1 %1340, %v832_v50   ;;  %891 = vperm.xlu0 %1339, %v833_v54   ;;  %v1113_v5 = vld [vmem:[%s1949_s6 + $0x8] sm:$0xff]  ;;  %v838_v6 = vpack.c.bf16 %v822_v2, %v821_v1  ;;  %v1114_v9 = vld [vmem:[%s1949_s6 + $0x10] sm:$0xff]  ;;  %v1115_v10 = vld [vmem:[%s1949_s6 + $0x18] sm:$0xff] }
  0x37   :  { %v1342_v7 = vld [vmem:[%s1944_s1 + $0x8] sm:$0xff]   ;;  %v1120_v11 = vpack.c.bf16 %v1113_v5, %v1112_v4  ;;  %v1116_v12 = vld [vmem:[%s1949_s6 + $0x20] sm:$0xff]  ;;  %v1121_v14 = vpack.c.bf16 %v1115_v10, %v1114_v9  ;;  %v1118_v15 = vld [vmem:[%s1949_s6 + $0x30] sm:$0xff] }
  0x38   :  { %1309 = vmatpush3.bf16.xpose.msra.mxu0 %v184_v45  ;;  %v1117_v13 = vld [vmem:[%s1949_s6 + $0x28] sm:$0xff]  ;;  %v1119_v16 = vld [vmem:[%s1949_s6 + $0x38] sm:$0xff]  ;;  %v1206_v19 = vld [vmem:[#allocation2] sm:$0x1] }
  0x39   :  { %1335 = vmatprep.subr.msk.bf16.mxu0 %vm140_vm0, %v83_v46  ;;  %v1122_v17 = vpack.c.bf16 %v1117_v13, %v1116_v12  ;;  %v1123_v18 = vpack.c.bf16 %v1119_v16, %v1118_v15  ;;  %v1344_v20 = vld [vmem:[%s1944_s1 + $0x18] sm:$0xff]   ;;  %v1345_v22 = vld [vmem:[%s1944_s1 + $0x20] sm:$0xff]   ;;  %v1346_v23 = vld [vmem:[%s1944_s1 + $0x28] sm:$0xff]  }
  0x3a   :  { %896 = vperm.xlu1 %1340, %v834_v57   ;;  %901 = vperm.xlu0 %1339, %v835_v61   ;;  %v1347_v24 = vld [vmem:[%s1944_s1 + $0x30] sm:$0xff]   ;;  %v1348_v25 = vld [vmem:[%s1944_s1 + $0x38] sm:$0xff]  }
  0x3e   :  { %906 = vperm.xlu1 %1340, %v836_v0   ;;  %911 = vperm.xlu0 %1339, %v837_v3  }
  0x40   :  { %1311 = vmatpush3.bf16.xpose.msra.mxu0 %v187_v60 }
  0x42   :  { %916 = vperm.xlu1 %1340, %v838_v6   ;;  %1126 = vperm.xlu0 %1339, %v1120_v11  }
  0x46   :  { %1131 = vperm.xlu1 %1340, %v1121_v14   ;;  %1136 = vperm.xlu0 %1339, %v1122_v17  }
  0x47   :  { %1313 = vmatmul.mubr.msk.bf16.vlgmr.msra.gmra.mrb[0].mxu0 %vm140_vm0, %v1503_v21  ;;  %v1343_v21 = vld [vmem:[%s1944_s1 + $0x10] sm:$0xff]  }
  0x48   :  { %1314 = vmatprep.mubr.msk.bf16.mxu0 %vm140_vm0, %v1342_v7 }
  0x4a   :  { %1141 = vperm.xlu1 %1340, %v1123_v18   ;;  %1209 = vperm.xlu0 %1339, %v1206_v19  }
  0x4f   :  { %1315 = vmatmul.mubr.msk.bf16.gmra.mrb[4].mxu0 %vm140_vm0, %v1342_v7 }
  0x50   :  { %1316 = vmatprep.mubr.msk.bf16.mxu0 %vm140_vm0, %v1343_v21 }
  0x57   :  { %1317 = vmatmul.mubr.msk.bf16.gmra.mrb[8].mxu0 %vm140_vm0, %v1343_v21 }
  0x58   :  { %1318 = vmatprep.mubr.msk.bf16.mxu0 %vm140_vm0, %v1344_v20 }
  0x5f   :  { %1319 = vmatmul.mubr.msk.bf16.gmra.mrb[12].mxu0 %vm140_vm0, %v1344_v20 }
  0x60   :  { %1320 = vmatprep.mubr.msk.bf16.mxu0 %vm140_vm0, %v1345_v22 }
  0x67   :  { %1321 = vmatmul.mubr.msk.bf16.gmra.mrb[16].mxu0 %vm140_vm0, %v1345_v22 }
  0x68   :  { %1322 = vmatprep.mubr.msk.bf16.mxu0 %vm140_vm0, %v1346_v23 }
  0x6f   :  { %1323 = vmatmul.mubr.msk.bf16.gmra.mrb[20].mxu0 %vm140_vm0, %v1346_v23 }
  0x70   :  { %1324 = vmatprep.mubr.msk.bf16.mxu0 %vm140_vm0, %v1347_v24 }
  0x77   :  { %1325 = vmatmul.mubr.msk.bf16.gmra.mrb[24].mxu0 %vm140_vm0, %v1347_v24 }
  0x78   :  { %1326 = vmatprep.mubr.msk.bf16.mxu0 %vm140_vm0, %v1348_v25 }
  0x7f   :  { %1327 = vmatmul.mubr.msk.bf16.gmra.mrb[28].mxu0 %vm140_vm0, %v1348_v25 }
  0x8b   :  { %v369_v31 = vpop.permute.xlu0 %368 }
  0x8c   :  { %v379_v53 = vpop.permute.xlu1 %378 }
  0x8f   :  { %v374_v42 = vpop.permute.xlu0 %373 }
  0x90   :  { %v384_v0 = vpop.permute.xlu1 %383 }
  0x93   :  { %v389_v12 = vpop.permute.xlu0 %388 }
  0x94   :  { %v394_v23 = vpop.permute.xlu1 %393 }
 0x11a   :  { %v247_v26 = vpop.f32.mrb[0].mxu0 }
 0x11b   :  { %v249_v27 = vpop.f32.mrb[1].mxu0 }
 0x11c   :  { %v251_v28 = vpop.f32.mrb[2].mxu0 }
 0x11d   :  { %v326_v29 = vpack.c.bf16 %v251_v28, %v247_v26  ;;  %v253_v30 = vpop.f32.mrb[3].mxu0 }
 0x11e   :  { %v327_v32 = vpack.c.bf16 %v253_v30, %v249_v27 }
 0x11f   :  { %v406_v33 = vadd.bf16 %v369_v31, %v326_v29 }
 0x120   :  { %v407_v34 = vadd.bf16 %v369_v31, %v327_v32 }
 0x121   :  { %v422_v38 = vmax.bf16 %v1401_v8, %v406_v33 }
 0x122   :  { %v257_v35 = vpop.f32.mrb[4].mxu0  ;;  %v423_v36 = vmax.bf16 %v1401_v8, %v407_v34  ;;  %v399_v34 = vpop.permute.xlu0 %398 }
 0x123   :  { %v259_v37 = vpop.f32.mrb[5].mxu0 }
 0x124   :  { %v261_v39 = vpop.f32.mrb[6].mxu0  ;;  %566 = vmatprep.subr.bf16.mxu1 %v423_v36 }
 0x125   :  { %v328_v40 = vpack.c.bf16 %v261_v39, %v257_v35  ;;  %v263_v41 = vpop.f32.mrb[7].mxu0  ;;  %567 = vmatpush1.bf16.msra.mxu1 %v422_v38 }
 0x126   :  { %v329_v43 = vpack.c.bf16 %v263_v41, %v259_v37 }
 0x127   :  { %v408_v44 = vadd.bf16 %v374_v42, %v328_v40 }
 0x128   :  { %v409_v45 = vadd.bf16 %v374_v42, %v329_v43 }
 0x129   :  { %v424_v49 = vmax.bf16 %v1401_v8, %v408_v44 }
 0x12a   :  { %v267_v46 = vpop.f32.mrb[8].mxu0  ;;  %v425_v47 = vmax.bf16 %v1401_v8, %v409_v45  ;;  %v404_v45 = vpop.permute.xlu1 %403 }
 0x12b   :  { %v269_v48 = vpop.f32.mrb[9].mxu0 }
 0x12c   :  { %v271_v50 = vpop.f32.mrb[10].mxu0  ;;  %568 = vmatprep.subr.bf16.mxu1 %v425_v47 }
 0x12d   :  { %v330_v51 = vpack.c.bf16 %v271_v50, %v267_v46  ;;  %v273_v52 = vpop.f32.mrb[11].mxu0  ;;  %569 = vmatpush1.bf16.msra.mxu1 %v424_v49 }
 0x12e   :  { %v331_v54 = vpack.c.bf16 %v273_v52, %v269_v48  ;;  %v1350_v52 = vld [vmem:[%s1946_s3 + $0x8] sm:$0xff]  }
 0x12f   :  { %v410_v55 = vadd.bf16 %v379_v53, %v330_v51  ;;  %v1349_v51 = vld [vmem:[%s1946_s3] sm:$0xff]  }
 0x130   :  { %v411_v56 = vadd.bf16 %v379_v53, %v331_v54  ;;  %v1351_v53 = vld [vmem:[%s1946_s3 + $0x10] sm:$0xff]   ;;  %v1352_v54 = vld [vmem:[%s1946_s3 + $0x18] sm:$0xff]  }
 0x131   :  { %v426_v60 = vmax.bf16 %v1401_v8, %v410_v55  ;;  %v1353_v55 = vld [vmem:[%s1946_s3 + $0x20] sm:$0xff]  }
 0x132   :  { %v277_v57 = vpop.f32.mrb[12].mxu0  ;;  %v427_v58 = vmax.bf16 %v1401_v8, %v411_v56  ;;  %v1354_v56 = vld [vmem:[%s1946_s3 + $0x28] sm:$0xff]  }
 0x133   :  { %v279_v59 = vpop.f32.mrb[13].mxu0 }
 0x134   :  { %v281_v61 = vpop.f32.mrb[14].mxu0  ;;  %570 = vmatprep.subr.bf16.mxu1 %v427_v58  ;;  %v1356_v58 = vld [vmem:[%s1946_s3 + $0x38] sm:$0xff]  }
 0x135   :  { %v332_v62 = vpack.c.bf16 %v281_v61, %v277_v57  ;;  %v283_v63 = vpop.f32.mrb[15].mxu0  ;;  %571 = vmatpush1.bf16.msra.mxu1 %v426_v60  ;;  %v1355_v57 = vld [vmem:[%s1946_s3 + $0x30] sm:$0xff]   ;;  %v1358_v60 = vld [vmem:[%s1946_s3 + $0x48] sm:$0xff]  }
 0x136   :  { %v333_v1 = vpack.c.bf16 %v283_v63, %v279_v59  ;;  %v1357_v59 = vld [vmem:[%s1946_s3 + $0x40] sm:$0xff]   ;;  %v1359_v61 = vld [vmem:[%s1946_s3 + $0x50] sm:$0xff]  }
 0x137   :  { %v412_v2 = vadd.bf16 %v384_v0, %v332_v62  ;;  %v1360_v62 = vld [vmem:[%s1946_s3 + $0x58] sm:$0xff]   ;;  %v1361_v63 = vld [vmem:[%s1946_s3 + $0x60] sm:$0xff]  }
 0x138   :  { %v413_v3 = vadd.bf16 %v384_v0, %v333_v1  ;;  %v1362_v0 = vld [vmem:[%s1946_s3 + $0x68] sm:$0xff]   ;;  %v1363_v1 = vld [vmem:[%s1946_s3 + $0x70] sm:$0xff]  }
 0x139   :  { %v428_v7 = vmax.bf16 %v1401_v8, %v412_v2  ;;  %v1364_v2 = vld [vmem:[%s1946_s3 + $0x78] sm:$0xff]  }
 0x13a   :  { %v287_v4 = vpop.f32.mrb[16].mxu0  ;;  %v429_v5 = vmax.bf16 %v1401_v8, %v413_v3 }
 0x13b   :  { %v289_v6 = vpop.f32.mrb[17].mxu0 }
 0x13c   :  { %v291_v9 = vpop.f32.mrb[18].mxu0  ;;  %572 = vmatprep.subr.bf16.mxu1 %v429_v5 }
 0x13d   :  { %v334_v10 = vpack.c.bf16 %v291_v9, %v287_v4  ;;  %v293_v11 = vpop.f32.mrb[19].mxu0  ;;  %573 = vmatpush1.bf16.msra.mxu1 %v428_v7  ;;  %v1367_v9 = vld [vmem:[%s1948_s5 + $0x4] ss:$8 sps:$4 sm:$0xff]  }
 0x13e   :  { %v335_v13 = vpack.c.bf16 %v293_v11, %v289_v6  ;;  %1063 = vmatprep.mubr.bf16.mxu0 %v1367_v9 }
 0x13f   :  { %v414_v14 = vadd.bf16 %v389_v12, %v334_v10  ;;  %v842_v10 = vpop.permute.xlu0 %841 }
 0x140   :  { %v415_v15 = vadd.bf16 %v389_v12, %v335_v13 }
 0x141   :  { %v430_v21 = vmax.bf16 %v1401_v8, %v414_v14 }
 0x142   :  { %v297_v16 = vpop.f32.mrb[20].mxu0  ;;  %v431_v17 = vmax.bf16 %v1401_v8, %v415_v15 }
 0x143   :  { %v299_v18 = vpop.f32.mrb[21].mxu0 }
 0x144   :  { %v301_v19 = vpop.f32.mrb[22].mxu0  ;;  %574 = vmatprep.subr.bf16.mxu1 %v431_v17 }
 0x145   :  { %v336_v20 = vpack.c.bf16 %v301_v19, %v297_v16  ;;  %v303_v22 = vpop.f32.mrb[23].mxu0  ;;  %575 = vmatpush1.bf16.msra.mxu1 %v430_v21 }
 0x146   :  { %v337_v24 = vpack.c.bf16 %v303_v22, %v299_v18 }
 0x147   :  { %v416_v25 = vadd.bf16 %v394_v23, %v336_v20  ;;  %v847_v20 = vpop.permute.xlu1 %846 }
 0x148   :  { %v417_v26 = vadd.bf16 %v394_v23, %v337_v24 }
 0x149   :  { %v432_v30 = vmax.bf16 %v1401_v8, %v416_v25 }
 0x14a   :  { %v307_v27 = vpop.f32.mrb[24].mxu0  ;;  %v433_v28 = vmax.bf16 %v1401_v8, %v417_v26 }
 0x14b   :  { %v309_v29 = vpop.f32.mrb[25].mxu0 }
 0x14c   :  { %v311_v31 = vpop.f32.mrb[26].mxu0  ;;  %576 = vmatprep.subr.bf16.mxu1 %v433_v28 }
 0x14d   :  { %v338_v32 = vpack.c.bf16 %v311_v31, %v307_v27  ;;  %v313_v33 = vpop.f32.mrb[27].mxu0  ;;  %577 = vmatpush1.bf16.msra.mxu1 %v432_v30 }
 0x14e   :  { %v339_v35 = vpack.c.bf16 %v313_v33, %v309_v29 }
 0x14f   :  { %v418_v36 = vadd.bf16 %v399_v34, %v338_v32  ;;  %v852_v32 = vpop.permute.xlu0 %851 }
 0x150   :  { %v419_v37 = vadd.bf16 %v399_v34, %v339_v35 }
 0x151   :  { %v434_v41 = vmax.bf16 %v1401_v8, %v418_v36 }
 0x152   :  { %v317_v38 = vpop.f32.mrb[28].mxu0  ;;  %v435_v39 = vmax.bf16 %v1401_v8, %v419_v37 }
 0x153   :  { %v319_v40 = vpop.f32.mrb[29].mxu0 }
 0x154   :  { %v321_v42 = vpop.f32.mrb[30].mxu0  ;;  %578 = vmatprep.subr.bf16.mxu1 %v435_v39 }
 0x155   :  { %v340_v43 = vpack.c.bf16 %v321_v42, %v317_v38  ;;  %v323_v44 = vpop.f32.mrb[31].mxu0  ;;  %579 = vmatpush1.bf16.msra.mxu1 %v434_v41 }
 0x156   :  { %v341_v46 = vpack.c.bf16 %v323_v44, %v319_v40 }
 0x157   :  { %v420_v47 = vadd.bf16 %v404_v45, %v340_v43  ;;  %v857_v43 = vpop.permute.xlu1 %856 }
 0x158   :  { %v421_v48 = vadd.bf16 %v404_v45, %v341_v46 }
 0x159   :  { %v436_v50 = vmax.bf16 %v1401_v8, %v420_v47 }
 0x15a   :  { %v437_v49 = vmax.bf16 %v1401_v8, %v421_v48 }
 0x15c   :  { %580 = vmatprep.subr.bf16.mxu1 %v437_v49 }
 0x15d   :  { %581 = vmatpush1.bf16.msra.mxu1 %v436_v50 }
 0x160   :  { %599 = vmatmul.mubr.bf16.vlgmr.msra.gmra.mrb[0].mxu1 %v1349_v51 }
 0x161   :  { %608 = vmatprep.mubr.bf16.mxu1 %v1401_v8 }
 0x168   :  { %609 = vmatmul.mubr.bf16.gmra.mrb[4].mxu1 %v1350_v52 }
 0x169   :  { %618 = vmatprep.mubr.bf16.mxu1 %v1401_v8 }
 0x170   :  { %619 = vmatmul.mubr.bf16.gmra.mrb[8].mxu1 %v1351_v53 }
 0x171   :  { %628 = vmatprep.mubr.bf16.mxu1 %v1401_v8 }
 0x178   :  { %629 = vmatmul.mubr.bf16.gmra.mrb[12].mxu1 %v1352_v54  ;;  %v862_v54 = vpop.permute.xlu0 %861 }
 0x179   :  { %638 = vmatprep.mubr.bf16.mxu1 %v1401_v8 }
 0x180   :  { %639 = vmatmul.mubr.bf16.gmra.mrb[16].mxu1 %v1353_v55 }
 0x181   :  { %648 = vmatprep.mubr.bf16.mxu1 %v1401_v8 }
 0x188   :  { %649 = vmatmul.mubr.bf16.gmra.mrb[20].mxu1 %v1354_v56 }
 0x189   :  { %658 = vmatprep.mubr.bf16.mxu1 %v1401_v8 }
 0x190   :  { %659 = vmatmul.mubr.bf16.gmra.mrb[24].mxu1 %v1355_v57 }
 0x191   :  { %668 = vmatprep.mubr.bf16.mxu1 %v1401_v8 }
 0x198   :  { %669 = vmatmul.mubr.bf16.gmra.mrb[28].mxu1 %v1356_v58 }
 0x199   :  { %678 = vmatprep.mubr.bf16.mxu1 %v1401_v8 }
 0x1a0   :  { %679 = vmatmul.mubr.bf16.gmra.mrb[32].mxu1 %v1357_v59 }
 0x1a1   :  { %688 = vmatprep.mubr.bf16.mxu1 %v1401_v8 }
 0x1a8   :  { %689 = vmatmul.mubr.bf16.gmra.mrb[36].mxu1 %v1358_v60 }
 0x1a9   :  { %698 = vmatprep.mubr.bf16.mxu1 %v1401_v8 }
 0x1b0   :  { %699 = vmatmul.mubr.bf16.gmra.mrb[40].mxu1 %v1359_v61 }
 0x1b1   :  { %708 = vmatprep.mubr.bf16.mxu1 %v1401_v8 }
 0x1b8   :  { %709 = vmatmul.mubr.bf16.gmra.mrb[44].mxu1 %v1360_v62 }
 0x1b9   :  { %718 = vmatprep.mubr.bf16.mxu1 %v1401_v8 }
 0x1c0   :  { %719 = vmatmul.mubr.bf16.gmra.mrb[48].mxu1 %v1361_v63 }
 0x1c1   :  { %728 = vmatprep.mubr.bf16.mxu1 %v1401_v8 }
 0x1c8   :  { %729 = vmatmul.mubr.bf16.gmra.mrb[52].mxu1 %v1362_v0 }
 0x1c9   :  { %738 = vmatprep.mubr.bf16.mxu1 %v1401_v8 }
 0x1d0   :  { %739 = vmatmul.mubr.bf16.gmra.mrb[56].mxu1 %v1363_v1  ;;  %v867_v1 = vpop.permute.xlu1 %866 }
 0x1d1   :  { %748 = vmatprep.mubr.bf16.mxu1 %v1401_v8 }
 0x1d8   :  { %749 = vmatmul.mubr.bf16.gmra.mrb[60].mxu1 %v1364_v2 }
 0x233   :  { %v600_v3 = vpop.f32.mrb[0].mxu1 }
 0x234   :  { %v602_v4 = vpop.f32.mrb[1].mxu1 }
 0x235   :  { %v604_v5 = vpop.f32.mrb[2].mxu1 }
 0x236   :  { %v759_v6 = vpack.c.bf16 %v604_v5, %v600_v3  ;;  %v606_v7 = vpop.f32.mrb[3].mxu1 }
 0x237   :  { %v760_v11 = vpack.c.bf16 %v606_v7, %v602_v4 }
 0x238   :  { %v919_v12 = vadd.bf16 %v842_v10, %v759_v6 }
 0x239   :  { %v920_v13 = vadd.bf16 %v842_v10, %v760_v11 }
 0x23a   :  { %v951_v16 = vmax.bf16 %v1401_v8, %v919_v12 }
 0x23b   :  { %v610_v14 = vpop.f32.mrb[4].mxu1  ;;  %v952_v15 = vmax.bf16 %v1401_v8, %v920_v13  ;;  %v872_v13 = vpop.permute.xlu0 %871 }
 0x23c   :  { %v612_v17 = vpop.f32.mrb[5].mxu1 }
 0x23d   :  { %v614_v18 = vpop.f32.mrb[6].mxu1  ;;  %1031 = vmatprep.subr.bf16.mxu0 %v952_v15 }
 0x23e   :  { %v761_v21 = vpack.c.bf16 %v614_v18, %v610_v14  ;;  %v616_v19 = vpop.f32.mrb[7].mxu1  ;;  %1032 = vmatpush1.bf16.msra.mxu0 %v951_v16 }
 0x23f   :  { %v762_v22 = vpack.c.bf16 %v616_v19, %v612_v17 }
 0x240   :  { %v921_v23 = vadd.bf16 %v847_v20, %v761_v21 }
 0x241   :  { %v922_v24 = vadd.bf16 %v847_v20, %v762_v22 }
 0x242   :  { %v953_v27 = vmax.bf16 %v1401_v8, %v921_v23 }
 0x243   :  { %v620_v25 = vpop.f32.mrb[8].mxu1  ;;  %v954_v26 = vmax.bf16 %v1401_v8, %v922_v24  ;;  %v877_v24 = vpop.permute.xlu1 %876 }
 0x244   :  { %v622_v28 = vpop.f32.mrb[9].mxu1 }
 0x245   :  { %v624_v29 = vpop.f32.mrb[10].mxu1  ;;  %1033 = vmatprep.subr.bf16.mxu0 %v954_v26 }
 0x246   :  { %v763_v30 = vpack.c.bf16 %v624_v29, %v620_v25  ;;  %v626_v31 = vpop.f32.mrb[11].mxu1  ;;  %1034 = vmatpush1.bf16.msra.mxu0 %v953_v27 }
 0x247   :  { %v764_v33 = vpack.c.bf16 %v626_v31, %v622_v28 }
 0x248   :  { %v923_v34 = vadd.bf16 %v852_v32, %v763_v30 }
 0x249   :  { %v924_v35 = vadd.bf16 %v852_v32, %v764_v33 }
 0x24a   :  { %v955_v38 = vmax.bf16 %v1401_v8, %v923_v34 }
 0x24b   :  { %v630_v36 = vpop.f32.mrb[12].mxu1  ;;  %v956_v37 = vmax.bf16 %v1401_v8, %v924_v35  ;;  %v882_v35 = vpop.permute.xlu0 %881 }
 0x24c   :  { %v632_v39 = vpop.f32.mrb[13].mxu1 }
 0x24d   :  { %v634_v40 = vpop.f32.mrb[14].mxu1  ;;  %1035 = vmatprep.subr.bf16.mxu0 %v956_v37 }
 0x24e   :  { %v765_v41 = vpack.c.bf16 %v634_v40, %v630_v36  ;;  %v636_v42 = vpop.f32.mrb[15].mxu1  ;;  %1036 = vmatpush1.bf16.msra.mxu0 %v955_v38 }
 0x24f   :  { %v766_v44 = vpack.c.bf16 %v636_v42, %v632_v39 }
 0x250   :  { %v925_v45 = vadd.bf16 %v857_v43, %v765_v41 }
 0x251   :  { %v926_v46 = vadd.bf16 %v857_v43, %v766_v44 }
 0x252   :  { %v957_v49 = vmax.bf16 %v1401_v8, %v925_v45 }
 0x253   :  { %v640_v47 = vpop.f32.mrb[16].mxu1  ;;  %v958_v48 = vmax.bf16 %v1401_v8, %v926_v46  ;;  %v887_v46 = vpop.permute.xlu1 %886 }
 0x254   :  { %v642_v50 = vpop.f32.mrb[17].mxu1 }
 0x255   :  { %v644_v51 = vpop.f32.mrb[18].mxu1  ;;  %1037 = vmatprep.subr.bf16.mxu0 %v958_v48 }
 0x256   :  { %v767_v52 = vpack.c.bf16 %v644_v51, %v640_v47  ;;  %v646_v53 = vpop.f32.mrb[19].mxu1  ;;  %1038 = vmatpush1.bf16.msra.mxu0 %v957_v49 }
 0x257   :  { %v768_v55 = vpack.c.bf16 %v646_v53, %v642_v50 }
 0x258   :  { %v927_v56 = vadd.bf16 %v862_v54, %v767_v52 }
 0x259   :  { %v928_v57 = vadd.bf16 %v862_v54, %v768_v55 }
 0x25a   :  { %v959_v60 = vmax.bf16 %v1401_v8, %v927_v56 }
 0x25b   :  { %v650_v58 = vpop.f32.mrb[20].mxu1  ;;  %v960_v59 = vmax.bf16 %v1401_v8, %v928_v57  ;;  %v892_v57 = vpop.permute.xlu0 %891 }
 0x25c   :  { %v652_v61 = vpop.f32.mrb[21].mxu1 }
 0x25d   :  { %v654_v62 = vpop.f32.mrb[22].mxu1  ;;  %1039 = vmatprep.subr.bf16.mxu0 %v960_v59 }
 0x25e   :  { %v769_v63 = vpack.c.bf16 %v654_v62, %v650_v58  ;;  %v656_v0 = vpop.f32.mrb[23].mxu1  ;;  %1040 = vmatpush1.bf16.msra.mxu0 %v959_v60 }
 0x25f   :  { %v770_v2 = vpack.c.bf16 %v656_v0, %v652_v61 }
 0x260   :  { %v929_v3 = vadd.bf16 %v867_v1, %v769_v63 }
 0x261   :  { %v930_v4 = vadd.bf16 %v867_v1, %v770_v2 }
 0x262   :  { %v961_v7 = vmax.bf16 %v1401_v8, %v929_v3 }
 0x263   :  { %v660_v5 = vpop.f32.mrb[24].mxu1  ;;  %v962_v6 = vmax.bf16 %v1401_v8, %v930_v4  ;;  %v897_v4 = vpop.permute.xlu1 %896 }
 0x264   :  { %v662_v9 = vpop.f32.mrb[25].mxu1 }
 0x265   :  { %v664_v10 = vpop.f32.mrb[26].mxu1  ;;  %1041 = vmatprep.subr.bf16.mxu0 %v962_v6 }
 0x266   :  { %v771_v11 = vpack.c.bf16 %v664_v10, %v660_v5  ;;  %v666_v12 = vpop.f32.mrb[27].mxu1  ;;  %1042 = vmatpush1.bf16.msra.mxu0 %v961_v7 }
 0x267   :  { %v772_v14 = vpack.c.bf16 %v666_v12, %v662_v9 }
 0x268   :  { %v931_v15 = vadd.bf16 %v872_v13, %v771_v11 }
 0x269   :  { %v932_v16 = vadd.bf16 %v872_v13, %v772_v14 }
 0x26a   :  { %v963_v21 = vmax.bf16 %v1401_v8, %v931_v15 }
 0x26b   :  { %v670_v17 = vpop.f32.mrb[28].mxu1  ;;  %v964_v18 = vmax.bf16 %v1401_v8, %v932_v16  ;;  %v902_v16 = vpop.permute.xlu0 %901 }
 0x26c   :  { %v672_v19 = vpop.f32.mrb[29].mxu1 }
 0x26d   :  { %v674_v20 = vpop.f32.mrb[30].mxu1  ;;  %1043 = vmatprep.subr.bf16.mxu0 %v964_v18 }
 0x26e   :  { %v773_v22 = vpack.c.bf16 %v674_v20, %v670_v17  ;;  %v676_v23 = vpop.f32.mrb[31].mxu1  ;;  %1044 = vmatpush1.bf16.msra.mxu0 %v963_v21 }
 0x26f   :  { %v774_v25 = vpack.c.bf16 %v676_v23, %v672_v19 }
 0x270   :  { %v933_v26 = vadd.bf16 %v877_v24, %v773_v22 }
 0x271   :  { %v934_v27 = vadd.bf16 %v877_v24, %v774_v25 }
 0x272   :  { %v965_v30 = vmax.bf16 %v1401_v8, %v933_v26 }
 0x273   :  { %v680_v28 = vpop.f32.mrb[32].mxu1  ;;  %v966_v29 = vmax.bf16 %v1401_v8, %v934_v27  ;;  %v907_v27 = vpop.permute.xlu1 %906 }
 0x274   :  { %v682_v31 = vpop.f32.mrb[33].mxu1 }
 0x275   :  { %v684_v32 = vpop.f32.mrb[34].mxu1  ;;  %1045 = vmatprep.subr.bf16.mxu0 %v966_v29 }
 0x276   :  { %v775_v33 = vpack.c.bf16 %v684_v32, %v680_v28  ;;  %v686_v34 = vpop.f32.mrb[35].mxu1  ;;  %1046 = vmatpush1.bf16.msra.mxu0 %v965_v30 }
 0x277   :  { %v776_v36 = vpack.c.bf16 %v686_v34, %v682_v31 }
 0x278   :  { %v935_v37 = vadd.bf16 %v882_v35, %v775_v33 }
 0x279   :  { %v936_v38 = vadd.bf16 %v882_v35, %v776_v36 }
 0x27a   :  { %v967_v41 = vmax.bf16 %v1401_v8, %v935_v37 }
 0x27b   :  { %v690_v39 = vpop.f32.mrb[36].mxu1  ;;  %v968_v40 = vmax.bf16 %v1401_v8, %v936_v38  ;;  %v912_v38 = vpop.permute.xlu0 %911 }
 0x27c   :  { %v692_v42 = vpop.f32.mrb[37].mxu1 }
 0x27d   :  { %v694_v43 = vpop.f32.mrb[38].mxu1  ;;  %1047 = vmatprep.subr.bf16.mxu0 %v968_v40 }
 0x27e   :  { %v777_v44 = vpack.c.bf16 %v694_v43, %v690_v39  ;;  %v696_v45 = vpop.f32.mrb[39].mxu1  ;;  %1048 = vmatpush1.bf16.msra.mxu0 %v967_v41 }
 0x27f   :  { %v778_v47 = vpack.c.bf16 %v696_v45, %v692_v42 }
 0x280   :  { %v937_v48 = vadd.bf16 %v887_v46, %v777_v44 }
 0x281   :  { %v938_v49 = vadd.bf16 %v887_v46, %v778_v47 }
 0x282   :  { %v969_v52 = vmax.bf16 %v1401_v8, %v937_v48 }
 0x283   :  { %v700_v50 = vpop.f32.mrb[40].mxu1  ;;  %v970_v51 = vmax.bf16 %v1401_v8, %v938_v49  ;;  %v917_v49 = vpop.permute.xlu1 %916 }
 0x284   :  { %v702_v53 = vpop.f32.mrb[41].mxu1 }
 0x285   :  { %v704_v54 = vpop.f32.mrb[42].mxu1  ;;  %1049 = vmatprep.subr.bf16.mxu0 %v970_v51 }
 0x286   :  { %v779_v55 = vpack.c.bf16 %v704_v54, %v700_v50  ;;  %v706_v56 = vpop.f32.mrb[43].mxu1  ;;  %1050 = vmatpush1.bf16.msra.mxu0 %v969_v52 }
 0x287   :  { %v780_v58 = vpack.c.bf16 %v706_v56, %v702_v53  ;;  %v1368_v56 = vld [vmem:[%s1948_s5 + $0x14] ss:$8 sps:$4 sm:$0xff]  }
 0x288   :  { %v939_v59 = vadd.bf16 %v892_v57, %v779_v55  ;;  %v1365_v55 = vld [vmem:[%s1948_s5] ss:$8 sps:$4 sm:$0xff]  }
 0x289   :  { %v940_v60 = vadd.bf16 %v892_v57, %v780_v58  ;;  %v1370_v57 = vld [vmem:[%s1948_s5 + $0x10] ss:$8 sps:$4 sm:$0xff]   ;;  %v1371_v58 = vld [vmem:[%s1948_s5 + $0x24] ss:$8 sps:$4 sm:$0xff]  }
 0x28a   :  { %v971_v63 = vmax.bf16 %v1401_v8, %v939_v59  ;;  %v1373_v59 = vld [vmem:[%s1948_s5 + $0x20] ss:$8 sps:$4 sm:$0xff]  }
 0x28b   :  { %v710_v61 = vpop.f32.mrb[44].mxu1  ;;  %v972_v62 = vmax.bf16 %v1401_v8, %v940_v60  ;;  %v1374_v60 = vld [vmem:[%s1948_s5 + $0x34] ss:$8 sps:$4 sm:$0xff]  }
 0x28c   :  { %v712_v0 = vpop.f32.mrb[45].mxu1 }
 0x28d   :  { %v714_v1 = vpop.f32.mrb[46].mxu1  ;;  %1051 = vmatprep.subr.bf16.mxu0 %v972_v62 }
 0x28e   :  { %v781_v2 = vpack.c.bf16 %v714_v1, %v710_v61  ;;  %v716_v3 = vpop.f32.mrb[47].mxu1  ;;  %1052 = vmatpush1.bf16.msra.mxu0 %v971_v63  ;;  %v1376_v61 = vld [vmem:[%s1948_s5 + $0x30] ss:$8 sps:$4 sm:$0xff]  }
 0x28f   :  { %v782_v5 = vpack.c.bf16 %v716_v3, %v712_v0  ;;  %v1127_v3 = vpop.permute.xlu0 %1126 }
 0x290   :  { %v941_v6 = vadd.bf16 %v897_v4, %v781_v2 }
 0x291   :  { %v942_v7 = vadd.bf16 %v897_v4, %v782_v5 }
 0x292   :  { %v973_v11 = vmax.bf16 %v1401_v8, %v941_v6 }
 0x293   :  { %v720_v9 = vpop.f32.mrb[48].mxu1  ;;  %v974_v10 = vmax.bf16 %v1401_v8, %v942_v7 }
 0x294   :  { %v722_v12 = vpop.f32.mrb[49].mxu1 }
 0x295   :  { %v724_v13 = vpop.f32.mrb[50].mxu1  ;;  %1053 = vmatprep.subr.bf16.mxu0 %v974_v10 }
 0x296   :  { %v783_v14 = vpack.c.bf16 %v724_v13, %v720_v9  ;;  %v726_v15 = vpop.f32.mrb[51].mxu1  ;;  %1054 = vmatpush1.bf16.msra.mxu0 %v973_v11 }
 0x297   :  { %v784_v17 = vpack.c.bf16 %v726_v15, %v722_v12  ;;  %v1132_v15 = vpop.permute.xlu1 %1131 }
 0x298   :  { %v943_v18 = vadd.bf16 %v902_v16, %v783_v14 }
 0x299   :  { %v944_v21 = vadd.bf16 %v902_v16, %v784_v17 }
 0x29a   :  { %v975_v22 = vmax.bf16 %v1401_v8, %v943_v18 }
 0x29b   :  { %v730_v19 = vpop.f32.mrb[52].mxu1  ;;  %v976_v20 = vmax.bf16 %v1401_v8, %v944_v21 }
 0x29c   :  { %v732_v23 = vpop.f32.mrb[53].mxu1 }
 0x29d   :  { %v734_v24 = vpop.f32.mrb[54].mxu1  ;;  %1055 = vmatprep.subr.bf16.mxu0 %v976_v20 }
 0x29e   :  { %v785_v25 = vpack.c.bf16 %v734_v24, %v730_v19  ;;  %v736_v26 = vpop.f32.mrb[55].mxu1  ;;  %1056 = vmatpush1.bf16.msra.mxu0 %v975_v22 }
 0x29f   :  { %v786_v28 = vpack.c.bf16 %v736_v26, %v732_v23  ;;  %v1137_v26 = vpop.permute.xlu0 %1136 }
 0x2a0   :  { %v945_v29 = vadd.bf16 %v907_v27, %v785_v25 }
 0x2a1   :  { %v946_v30 = vadd.bf16 %v907_v27, %v786_v28 }
 0x2a2   :  { %v977_v33 = vmax.bf16 %v1401_v8, %v945_v29 }
 0x2a3   :  { %v740_v31 = vpop.f32.mrb[56].mxu1  ;;  %v978_v32 = vmax.bf16 %v1401_v8, %v946_v30 }
 0x2a4   :  { %v742_v34 = vpop.f32.mrb[57].mxu1 }
 0x2a5   :  { %v744_v35 = vpop.f32.mrb[58].mxu1  ;;  %1057 = vmatprep.subr.bf16.mxu0 %v978_v32 }
 0x2a6   :  { %v787_v36 = vpack.c.bf16 %v744_v35, %v740_v31  ;;  %v746_v37 = vpop.f32.mrb[59].mxu1  ;;  %1058 = vmatpush1.bf16.msra.mxu0 %v977_v33 }
 0x2a7   :  { %v788_v39 = vpack.c.bf16 %v746_v37, %v742_v34  ;;  %v1142_v37 = vpop.permute.xlu1 %1141 }
 0x2a8   :  { %v947_v40 = vadd.bf16 %v912_v38, %v787_v36 }
 0x2a9   :  { %v948_v41 = vadd.bf16 %v912_v38, %v788_v39 }
 0x2aa   :  { %v979_v44 = vmax.bf16 %v1401_v8, %v947_v40 }
 0x2ab   :  { %v750_v42 = vpop.f32.mrb[60].mxu1  ;;  %v980_v43 = vmax.bf16 %v1401_v8, %v948_v41 }
 0x2ac   :  { %v752_v45 = vpop.f32.mrb[61].mxu1 }
 0x2ad   :  { %v754_v46 = vpop.f32.mrb[62].mxu1  ;;  %1059 = vmatprep.subr.bf16.mxu0 %v980_v43  ;;  %v1160_v43 = vld [vmem:[%s1950_s7] sm:$0xf]  ;;  %s1247_s7 = sshll.u32 %s1403_s12, 4  ;;  %s1248_s7 = int_to_ptr.vmem [resolvable:$true] %s1247_s7 }
 0x2ae   :  { %v789_v47 = vpack.c.bf16 %v754_v46, %v750_v42  ;;  %v756_v48 = vpop.f32.mrb[63].mxu1  ;;  %1060 = vmatpush1.bf16.msra.mxu0 %v979_v44  ;;  %v1212_v44 = vlaneseq  ;;  %v1402_v46 = vmov 1966171168   ;;  %s1377_s13 = scalar_lea.vmem %s1248_s7, 32  ;;  %p1382_p1 = scmp.lt.s32.totalorder %s1248_s7, %s1248_s7 }
 0x2af   :  { %v790_v50 = vpack.c.bf16 %v756_v48, %v752_v45  ;;  %p1378_p0 = scmp.ne.s32.totalorder %s1248_s7, %s1377_s13  ;;  %p1383_p2 = scmp.lt.s32.totalorder %s1377_s13, %s1377_s13 }
 0x2b0   :  { %v949_v51 = vadd.bf16 %v917_v49, %v789_v47  ;;  %v1213_v45 = vshrl.u32 %v1212_v44, 7  ;;  %v1222_v47 = vunpack.c.l.s4 %v1402_v46  ;;  %vm1238_vm2 = vcmp.lt.s32.totalorder %v1212_v44, 256 }
 0x2b1   :  { %v950_v52 = vadd.bf16 %v917_v49, %v790_v50  ;;  %v1210_v49 = vpop.permute.xlu0 %1209  ;;  %p1384_p3 = por %p1383_p2, %p1382_p1 }
 0x2b2   :  { %v981_v54 = vmax.bf16 %v1401_v8, %v949_v51  ;;  %v1214_v48 = vsub.s32 0, %v1213_v45  ;;  %v1223_v50 = vunpack.c.0.s8 %v1222_v47 }
 0x2b3   :  { %v982_v53 = vmax.bf16 %v1401_v8, %v950_v52  ;;  %p1385_p4 = pnand %p1384_p3, %p1378_p0 }
 0x2b4   :  { %v1215_v51 = vrot.slane %v1210_v49, %v1214_v48 }
 0x2b5   :  { %1061 = vmatprep.subr.bf16.mxu0 %v982_v53 }
 0x2b6   :  { %1062 = vmatpush1.bf16.msra.mxu0 %v981_v54 }
 0x2b9   :  { %1064 = vmatmul.mubr.bf16.vlgmr.msra.gmra.mrb[32].mxu0 %v1365_v55  ;;  %v1226_v55 = vsub.s32 %v1223_v50, %v1213_v45 }
 0x2ba   :  { %1073 = vmatprep.mubr.bf16.mxu0 %v1368_v56 }
 0x2c1   :  { %1074 = vmatmul.mubr.bf16.gmra.mrb[36].mxu0 %v1370_v57 }
 0x2c2   :  { %1083 = vmatprep.mubr.bf16.mxu0 %v1371_v58 }
 0x2c9   :  { %1084 = vmatmul.mubr.bf16.gmra.mrb[40].mxu0 %v1373_v59 }
 0x2ca   :  { %1093 = vmatprep.mubr.bf16.mxu0 %v1374_v60 }
 0x2d1   :  { %1094 = vmatmul.mubr.bf16.gmra.mrb[44].mxu0 %v1376_v61 }
 0x2d2   :  { %1197 = vmatprep.mubr.bf16.mxu0 %v1401_v8 }
 0x38c   :  { %v1065_v62 = vpop.f32.mrb[32].mxu0 }
 0x38d   :  { %v1067_v63 = vpop.f32.mrb[33].mxu0 }
 0x38e   :  { %v1069_v0 = vpop.f32.mrb[34].mxu0 }
 0x38f   :  { %v1104_v1 = vpack.c.bf16 %v1069_v0, %v1065_v62  ;;  %v1071_v2 = vpop.f32.mrb[35].mxu0 }
 0x390   :  { %v1105_v4 = vpack.c.bf16 %v1071_v2, %v1067_v63 }
 0x391   :  { %v1144_v5 = vadd.bf16 %v1127_v3, %v1104_v1 }
 0x392   :  { %v1145_v6 = vadd.bf16 %v1127_v3, %v1105_v4 }
 0x393   :  { %v1152_v10 = vmax.bf16 %v1401_v8, %v1144_v5 }
 0x394   :  { %v1075_v7 = vpop.f32.mrb[36].mxu0  ;;  %v1153_v9 = vmax.bf16 %v1401_v8, %v1145_v6 }
 0x395   :  { %v1077_v11 = vpop.f32.mrb[37].mxu0 }
 0x396   :  { %v1079_v12 = vpop.f32.mrb[38].mxu0  ;;  %1165 = vmatprep.subr.bf16.mxu0 %v1153_v9 }
 0x397   :  { %v1106_v13 = vpack.c.bf16 %v1079_v12, %v1075_v7  ;;  %v1081_v14 = vpop.f32.mrb[39].mxu0  ;;  %1166 = vmatpush1.bf16.msra.mxu0 %v1152_v10 }
 0x398   :  { %v1107_v16 = vpack.c.bf16 %v1081_v14, %v1077_v11 }
 0x399   :  { %v1146_v17 = vadd.bf16 %v1132_v15, %v1106_v13 }
 0x39a   :  { %v1147_v18 = vadd.bf16 %v1132_v15, %v1107_v16 }
 0x39b   :  { %v1154_v20 = vmax.bf16 %v1401_v8, %v1146_v17 }
 0x39c   :  { %v1085_v21 = vpop.f32.mrb[40].mxu0  ;;  %v1155_v19 = vmax.bf16 %v1401_v8, %v1147_v18 }
 0x39d   :  { %v1087_v22 = vpop.f32.mrb[41].mxu0 }
 0x39e   :  { %v1089_v23 = vpop.f32.mrb[42].mxu0  ;;  %1167 = vmatprep.subr.bf16.mxu0 %v1155_v19 }
 0x39f   :  { %v1108_v24 = vpack.c.bf16 %v1089_v23, %v1085_v21  ;;  %v1091_v25 = vpop.f32.mrb[43].mxu0  ;;  %1168 = vmatpush1.bf16.msra.mxu0 %v1154_v20 }
 0x3a0   :  { %v1109_v27 = vpack.c.bf16 %v1091_v25, %v1087_v22 }
 0x3a1   :  { %v1148_v28 = vadd.bf16 %v1137_v26, %v1108_v24 }
 0x3a2   :  { %v1149_v29 = vadd.bf16 %v1137_v26, %v1109_v27 }
 0x3a3   :  { %v1156_v32 = vmax.bf16 %v1401_v8, %v1148_v28 }
 0x3a4   :  { %v1095_v30 = vpop.f32.mrb[44].mxu0  ;;  %v1157_v31 = vmax.bf16 %v1401_v8, %v1149_v29 }
 0x3a5   :  { %v1097_v33 = vpop.f32.mrb[45].mxu0 }
 0x3a6   :  { %v1099_v34 = vpop.f32.mrb[46].mxu0  ;;  %1169 = vmatprep.subr.bf16.mxu0 %v1157_v31 }
 0x3a7   :  { %v1110_v35 = vpack.c.bf16 %v1099_v34, %v1095_v30  ;;  %v1101_v36 = vpop.f32.mrb[47].mxu0  ;;  %1170 = vmatpush1.bf16.msra.mxu0 %v1156_v32 }
 0x3a8   :  { %v1111_v38 = vpack.c.bf16 %v1101_v36, %v1097_v33 }
 0x3a9   :  { %v1150_v39 = vadd.bf16 %v1142_v37, %v1110_v35 }
 0x3aa   :  { %v1151_v40 = vadd.bf16 %v1142_v37, %v1111_v38 }
 0x3ab   :  { %v1158_v42 = vmax.bf16 %v1401_v8, %v1150_v39 }
 0x3ac   :  { %v1159_v41 = vmax.bf16 %v1401_v8, %v1151_v40 }
 0x3ae   :  { %1171 = vmatprep.subr.bf16.mxu0 %v1159_v41 }
 0x3af   :  { %1172 = vmatpush1.bf16.msra.mxu0 %v1158_v42 }
 0x3b2   :  { %1295 = vmatmul.mubr.msk.bf16.vlgmr.msra.gmra.mrb[48].mxu0 %vm1161_vm1, %v1160_v43 }
 0x485   :  { %v1199_v52 = vpop.f32.mrb[48].mxu0 }
 0x486   :  { %v1216_v53 = vadd.f32 %v1215_v51, %v1199_v52  ;;  %v1201_v54 = vpop.f32.mrb[49].mxu0 }
 0x487   :  { %v1217_v8 = vadd.f32 %v1215_v51, %v1201_v54  ;;  %v1203_v56 = vpop.f32.mrb[50].mxu0 }
 0x488   :  { %v1204_v57 = vpop.f32.mrb[51].mxu0 }
 0x489   :  { %v1220_v58 = vcombine.low %v1216_v53, %v1217_v8 }
 0x48b   :  { %v1227_v59 = vrot.slane %v1220_v58, %v1226_v55 }
 0x48d   :  { %v1234_v60 = vrot.slane %v1227_v59, %v1226_v55 }
 0x48f   :  { %1240 = vst.msk [vmem:[#allocation3] sm:$0x3] %vm1238_vm2, %v1234_v60 }
 0x490   :  { %1388 = shalt.err (!%p1385_p4)
}
 0x491   :  { %s1389_s16 = scalar_lea.hbm %s1952_s9, 32 }
 0x492   :  { %p1390_p5 = scmp.ne.s32.totalorder %s1952_s9, %s1389_s16  ;;  %p1393_p6 = scmp.lt.u32.totalorder %s1389_s16, %s1952_s9 }
 0x494   :  { %p1395_p7 = pnand %p1393_p6, %p1390_p5 }
 0x496   :  { %1398 = shalt.err (!%p1395_p7)
}
 0x497   :  { %1250 = dma.vmem_to_hbm [thread:$0]  %s1248_s7, 32, %s1952_s9, [#allocation4]  }
 0x498   :  { %1399 = dma.done.wait [#allocation4], 32  }
 0x499   :  { %1400 = vsyncadd [#allocation4], 4294967264 }
 0x49a   :  { %1254 = vsyncpa [#allocation4], 1 }

</bundles_post_ra>
